<compile_context>
chip_gen: v5e
topology: v5e:2x2
jax: 0.10.0
libtpu: 0.0.40
codegen_flags: <defaults>
</compile_context>

<pallas_src>
import numpy as np
import jax
import jax.numpy as jnp
from jax.experimental import pallas as pl
from jax.experimental.pallas import tpu as pltpu


def single_conv(x_nchw, weight_hwio, bias):
    """SingleConv forward: Conv3x3(pad=1)+bias -> LeakyReLU(0.2) -> MaxPool2x2.

    x_nchw: (N, Cin, H, W) -> (N, Cout, H//2, W//2)
    """
    N, Cin, H, W = x_nchw.shape
    Cout = weight_hwio.shape[-1]
    assert H % 2 == 0 and W % 2 == 0
    HW = H * W
    Ho, Wo = H // 2, W // 2
    HWo = Ho * Wo
    NHW = N * HW
    NHWo = N * HWo
    xdt = x_nchw.dtype

    # Per-image slab inside the zero-margined flat line buffer (margin >= W+1).
    margin = ((W + 1 + 127) // 128) * 128
    seg = HW + 2 * margin

    # Dense im2col K: 9 taps * Cin channels + 1 bias row, padded to a sublane tile.
    KB = 9 * Cin
    Kpad = ((KB + 1 + 7) // 8) * 8

    # ---- host-side constants (numpy) ---------------------------------------
    # Decimation matrix: dec[m, p] = 1 iff flat conv index m is the top-left
    # corner of 2x2 pool window p.  (HW, HWo) only -- applied per image, so it
    # does not grow with batch (64 KiB here vs the old 256 KiB selector).
    p_idx = np.arange(HWo, dtype=np.int64)
    tl = 2 * (p_idx // Wo) * W + 2 * (p_idx % Wo)
    dec_np = np.zeros((HW, HWo), np.float32)
    dec_np[tl, p_idx] = 1.0

    # ---- tiny one-time parameter prep ---------------------------------------
    # w2[:, t*Cin + c] = weight[ky, kx, c, :] with t = ky*3 + kx; the bias is
    # folded in as column KB (matched by a row of ones in the patch matrix).
    w_flat = jnp.reshape(weight_hwio, (KB, Cout))                  # rows: t*Cin + c
    w2 = jnp.transpose(w_flat).astype(jnp.float32)                 # (Cout, KB)
    w2 = jnp.concatenate(
        [w2, jnp.reshape(bias, (Cout, 1)).astype(jnp.float32)], axis=1)
    w2 = jnp.pad(w2, ((0, 0), (0, Kpad - KB - 1)))                 # (Cout, Kpad)

    x_flat = jnp.reshape(x_nchw, (N, Cin, HW))                     # free reshape

    def kernel(x_ref, w_ref, dec_ref, o_ref, line_ref, p_ref):
        # --- one-time scratch init (single invocation) --------------------
        # Zero only the margins; the data region is fully overwritten below.
        zero_m = jnp.zeros((Cin, margin), xdt)
        for n in range(N):
            base = n * seg
            line_ref[:, base:base + margin] = zero_m
            line_ref[:, base + margin + HW:base + seg] = zero_m
            line_ref[:, base + margin:base + margin + HW] = x_ref[n]
        # Tail rows of the patch matrix: one row of ones (bias) + zero pad rows.
        row = jax.lax.broadcasted_iota(jnp.int32, (Kpad - KB, NHW), 0)
        p_ref[KB:Kpad, :] = (row == 0).astype(xdt)

        # --- column masks built in-kernel (no extra HBM input / DMA) -------
        col = jax.lax.broadcasted_iota(jnp.int32, (1, HW), 1) % W
        ok_l = col >= 1          # w-1 >= 0
        ok_r = col <= W - 2      # w+1 <  W

        # --- im2col: densely packed (tap-major, Cin-minor) patch -----------
        t = 0
        for dy in (-1, 0, 1):
            for dx in (-1, 0, 1):
                s = dy * W + dx
                for n in range(N):
                    base = n * seg + margin
                    patch = line_ref[:, base + s:base + s + HW]    # (Cin, HW)
                    if dx == -1:
                        patch = jnp.where(ok_l, patch, jnp.zeros_like(patch))
                    elif dx == 1:
                        patch = jnp.where(ok_r, patch, jnp.zeros_like(patch))
                    p_ref[t * Cin:(t + 1) * Cin, n * HW:(n + 1) * HW] = patch
                t += 1

        # --- fused conv + bias: one (Cout,Kpad)x(Kpad,N*HW) MXU dot, f32 acc
        acc = jnp.dot(w_ref[...], p_ref[...],
                      preferred_element_type=jnp.float32)          # (Cout, N*HW)
        acc = jnp.maximum(acc, 0.2 * acc)                          # LeakyReLU(0.2)

        # --- MaxPool 2x2 / stride 2 -----------------------------------------
        # Window max at every position via two XLU lane rolls + VPU maxes.
        # Positive roll amounts (jnp.roll convention): rolling by NHW-k brings
        # lane m+k to lane m.  Wrap-around only touches lanes the decimation
        # below never selects (odd rows / odd cols / last row+col).
        shift_c = pltpu.roll(acc, NHW - 1, axis=1)     # value at (row, col+1)
        m1 = jnp.maximum(acc, shift_c)
        shift_r = pltpu.roll(m1, NHW - W, axis=1)      # same, one row down
        wmax = jnp.maximum(m1, shift_r)                # 2x2 window max at top-left

        # Decimate to even rows / even cols with one small exact 0/1 matmul per
        # image (dec has a single 1.0 per column).
        pooled = [
            jnp.dot(wmax[:, n * HW:(n + 1) * HW], dec_ref[...],
                    preferred_element_type=jnp.float32)
            for n in range(N)
        ]
        # (Cout, N*HWo) = (8, 128): lane-dense, unmasked output store.
        o_ref[...] = jnp.concatenate(pooled, axis=1).astype(o_ref.dtype)

    out_flat = pl.pallas_call(
        kernel,
        out_shape=jax.ShapeDtypeStruct((Cout, NHWo), xdt),
        scratch_shapes=[
            pltpu.VMEM((Cin, N * seg), xdt),   # zero-margined flat line buffer
            pltpu.VMEM((Kpad, NHW), xdt),      # dense im2col patch matrix
        ],
        compiler_params=pltpu.CompilerParams(
            vmem_limit_bytes=32 * 1024 * 1024,
        ),
    )(x_flat, w2, jnp.asarray(dec_np))

    # Un-fold the batch from the lane axis back to NCHW (tiny ~4 KiB transpose).
    out = jnp.reshape(out_flat, (Cout, N, Ho, Wo))
    return jnp.transpose(out, (1, 0, 2, 3))


def _reference(x_nchw, weight_hwio, bias):
    # Pure-JAX reference for verification.
    w_oihw = jnp.transpose(weight_hwio, (3, 2, 0, 1))
    y = jax.lax.conv_general_dilated(
        x_nchw, w_oihw, window_strides=(1, 1), padding=((1, 1), (1, 1)),
        dimension_numbers=("NCHW", "OIHW", "NCHW"))
    y = y + bias.reshape(1, -1, 1, 1)
    y = jnp.where(y >= 0, y, 0.2 * y)
    y = jax.lax.reduce_window(
        y, -jnp.inf, jax.lax.max,
        window_dimensions=(1, 1, 2, 2), window_strides=(1, 1, 2, 2),
        padding="VALID")
    return y


if __name__ == "__main__":
    # Small shapes consistent with the module: batch=2, in_dim=4, out_dim=8,
    # spatial=16x16.
    N, Cin, Cout, H, W = 2, 4, 8, 16, 16

    key = jax.random.PRNGKey(0)
    kx, kw, kb = jax.random.split(key, 3)

    x = jax.random.normal(kx, (N, Cin, H, W), dtype=jnp.float32)
    weight_hwio = 0.1 * jax.random.normal(kw, (3, 3, Cin, Cout), dtype=jnp.float32)
    bias = 0.1 * jax.random.normal(kb, (Cout,), dtype=jnp.float32)

    out = jax.block_until_ready(single_conv(x, weight_hwio, bias))
    ref = jax.block_until_ready(_reference(x, weight_hwio, bias))

    assert out.shape == (N, Cout, H // 2, W // 2), out.shape
    assert jnp.allclose(out, ref, atol=1e-4, rtol=1e-4), "mismatch vs reference"
    print("KERNEL_OK")
</pallas_src>

<mosaic_0001>
module attributes {stable_mosaic.version = 11 : i64} {
  func.func @kernel(%arg0: memref<2x4x256xf32, #tpu.memory_space<vmem>>, %arg1: memref<8x40xf32, #tpu.memory_space<vmem>>, %arg2: memref<256x64xf32, #tpu.memory_space<vmem>>, %arg3: memref<8x128xf32, #tpu.memory_space<vmem>>, %arg4: memref<4x1024xf32, #tpu.memory_space<vmem>>, %arg5: memref<40x512xf32, #tpu.memory_space<vmem>>) attributes {dimension_semantics = [], scalar_prefetch = 0 : i64, scratch_operands = 2 : i64, tpu.core_type = #tpu.core_type<tc>} {
    %cst = arith.constant 0.000000e+00 : f32
    %0 = vector.broadcast %cst : f32 to vector<4x128xf32>
    %c0 = arith.constant 0 : index
    %c0_0 = arith.constant 0 : index
    %1 = vector.load %arg4[%c0, %c0_0] : memref<4x1024xf32, #tpu.memory_space<vmem>>, vector<4x128xf32>
    tpu.vector_store %arg4[%c0, %c0_0], %0 {strides = array<i32>} : memref<4x1024xf32, #tpu.memory_space<vmem>>, vector<4x128xf32>,
    %c0_1 = arith.constant 0 : index
    %c384 = arith.constant 384 : index
    %2 = vector.load %arg4[%c0_1, %c384] : memref<4x1024xf32, #tpu.memory_space<vmem>>, vector<4x128xf32>
    tpu.vector_store %arg4[%c0_1, %c384], %0 {strides = array<i32>} : memref<4x1024xf32, #tpu.memory_space<vmem>>, vector<4x128xf32>,
    %c0_2 = arith.constant 0 : index
    %c0_3 = arith.constant 0 : index
    %c0_4 = arith.constant 0 : index
    %3 = vector.load %arg0[%c0_2, %c0_3, %c0_4] : memref<2x4x256xf32, #tpu.memory_space<vmem>>, vector<1x4x256xf32>
    %4 = vector.shape_cast %3 : vector<1x4x256xf32> to vector<4x256xf32>
    %c0_5 = arith.constant 0 : index
    %c128 = arith.constant 128 : index
    %5 = vector.load %arg4[%c0_5, %c128] : memref<4x1024xf32, #tpu.memory_space<vmem>>, vector<4x256xf32>
    tpu.vector_store %arg4[%c0_5, %c128], %4 {strides = array<i32>} : memref<4x1024xf32, #tpu.memory_space<vmem>>, vector<4x256xf32>,
    %c0_6 = arith.constant 0 : index
    %c512 = arith.constant 512 : index
    %6 = vector.load %arg4[%c0_6, %c512] : memref<4x1024xf32, #tpu.memory_space<vmem>>, vector<4x128xf32>
    tpu.vector_store %arg4[%c0_6, %c512], %0 {strides = array<i32>} : memref<4x1024xf32, #tpu.memory_space<vmem>>, vector<4x128xf32>,
    %c0_7 = arith.constant 0 : index
    %c896 = arith.constant 896 : index
    %7 = vector.load %arg4[%c0_7, %c896] : memref<4x1024xf32, #tpu.memory_space<vmem>>, vector<4x128xf32>
    tpu.vector_store %arg4[%c0_7, %c896], %0 {strides = array<i32>} : memref<4x1024xf32, #tpu.memory_space<vmem>>, vector<4x128xf32>,
    %c1 = arith.constant 1 : index
    %c0_8 = arith.constant 0 : index
    %c0_9 = arith.constant 0 : index
    %8 = vector.load %arg0[%c1, %c0_8, %c0_9] : memref<2x4x256xf32, #tpu.memory_space<vmem>>, vector<1x4x256xf32>
    %9 = vector.shape_cast %8 : vector<1x4x256xf32> to vector<4x256xf32>
    %c0_10 = arith.constant 0 : index
    %c640 = arith.constant 640 : index
    %10 = vector.load %arg4[%c0_10, %c640] : memref<4x1024xf32, #tpu.memory_space<vmem>>, vector<4x256xf32>
    tpu.vector_store %arg4[%c0_10, %c640], %9 {strides = array<i32>} : memref<4x1024xf32, #tpu.memory_space<vmem>>, vector<4x256xf32>,
    %11 = tpu.iota {dimensions = array<i32: 0>} : vector<4x512xi32>
    %c0_i32 = arith.constant 0 : i32
    %12 = vector.broadcast %c0_i32 : i32 to vector<4x512xi32>
    %13 = arith.cmpi eq, %11, %12 : vector<4x512xi32>
    %14 = arith.extui %13 : vector<4x512xi1> to vector<4x512xi32>
    %15 = arith.sitofp %14 : vector<4x512xi32> to vector<4x512xf32>
    %c36 = arith.constant 36 : index
    %c0_11 = arith.constant 0 : index
    %16 = vector.load %arg5[%c36, %c0_11] : memref<40x512xf32, #tpu.memory_space<vmem>>, vector<4x512xf32>
    tpu.vector_store %arg5[%c36, %c0_11], %15 {strides = array<i32>} : memref<40x512xf32, #tpu.memory_space<vmem>>, vector<4x512xf32>,
    %17 = tpu.iota {dimensions = array<i32: 1>} : vector<1x256xi32>
    %c16_i32 = arith.constant 16 : i32
    %c0_i32_12 = arith.constant 0 : i32
    %18 = arith.cmpi eq, %c16_i32, %c0_i32_12 : i32
    %c1_i32 = arith.constant 1 : i32
    %19 = arith.select %18, %c1_i32, %c16_i32 : i32
    %20 = vector.broadcast %19 : i32 to vector<1x256xi32>
    %21 = arith.remsi %17, %20 : vector<1x256xi32>
    %c0_i32_13 = arith.constant 0 : i32
    %22 = vector.broadcast %c0_i32_13 : i32 to vector<1x256xi32>
    %23 = arith.cmpi ne, %21, %22 : vector<1x256xi32>
    %c0_i32_14 = arith.constant 0 : i32
    %24 = vector.broadcast %c0_i32_14 : i32 to vector<1x256xi32>
    %25 = arith.cmpi slt, %21, %24 : vector<1x256xi32>
    %c0_i32_15 = arith.constant 0 : i32
    %26 = arith.cmpi slt, %19, %c0_i32_15 : i32
    %27 = vector.broadcast %26 : i1 to vector<1x256xi1>
    %28 = vector.broadcast %27 : vector<1x256xi1> to vector<1x256xi1>
    %29 = arith.xori %25, %28 : vector<1x256xi1>
    %30 = arith.andi %29, %23 : vector<1x256xi1>
    %31 = vector.broadcast %19 : i32 to vector<1x256xi32>
    %32 = arith.addi %21, %31 : vector<1x256xi32>
    %33 = arith.select %30, %32, %21 : vector<1x256xi1>, vector<1x256xi32>
    %c1_i32_16 = arith.constant 1 : i32
    %34 = vector.broadcast %c1_i32_16 : i32 to vector<1x256xi32>
    %35 = arith.cmpi sge, %33, %34 : vector<1x256xi32>
    %c14_i32 = arith.constant 14 : i32
    %36 = vector.broadcast %c14_i32 : i32 to vector<1x256xi32>
    %37 = arith.cmpi sle, %33, %36 : vector<1x256xi32>
    %c0_17 = arith.constant 0 : index
    %c111 = arith.constant 111 : index
    %38 = vector.load %arg4[%c0_17, %c111] : memref<4x1024xf32, #tpu.memory_space<vmem>>, vector<4x256xf32>
    %cst_18 = arith.constant 0.000000e+00 : f32
    %39 = vector.broadcast %cst_18 : f32 to vector<4x256xf32>
    %40 = vector.shape_cast %35 : vector<1x256xi1> to vector<1x256xi1>
    %41 = vector.broadcast %40 : vector<1x256xi1> to vector<4x256xi1>
    %42 = arith.select %41, %38, %39 : vector<4x256xi1>, vector<4x256xf32>
    %c0_19 = arith.constant 0 : index
    %c0_20 = arith.constant 0 : index
    %43 = vector.load %arg5[%c0_19, %c0_20] : memref<40x512xf32, #tpu.memory_space<vmem>>, vector<4x256xf32>
    tpu.vector_store %arg5[%c0_19, %c0_20], %42 {strides = array<i32>} : memref<40x512xf32, #tpu.memory_space<vmem>>, vector<4x256xf32>,
    %c0_21 = arith.constant 0 : index
    %c623 = arith.constant 623 : index
    %44 = vector.load %arg4[%c0_21, %c623] : memref<4x1024xf32, #tpu.memory_space<vmem>>, vector<4x256xf32>
    %cst_22 = arith.constant 0.000000e+00 : f32
    %45 = vector.broadcast %cst_22 : f32 to vector<4x256xf32>
    %46 = vector.shape_cast %35 : vector<1x256xi1> to vector<1x256xi1>
    %47 = vector.broadcast %46 : vector<1x256xi1> to vector<4x256xi1>
    %48 = arith.select %47, %44, %45 : vector<4x256xi1>, vector<4x256xf32>
    %c0_23 = arith.constant 0 : index
    %c256 = arith.constant 256 : index
    %49 = vector.load %arg5[%c0_23, %c256] : memref<40x512xf32, #tpu.memory_space<vmem>>, vector<4x256xf32>
    tpu.vector_store %arg5[%c0_23, %c256], %48 {strides = array<i32>} : memref<40x512xf32, #tpu.memory_space<vmem>>, vector<4x256xf32>,
    %c0_24 = arith.constant 0 : index
    %c112 = arith.constant 112 : index
    %50 = vector.load %arg4[%c0_24, %c112] : memref<4x1024xf32, #tpu.memory_space<vmem>>, vector<4x256xf32>
    %c4 = arith.constant 4 : index
    %c0_25 = arith.constant 0 : index
    %51 = vector.load %arg5[%c4, %c0_25] : memref<40x512xf32, #tpu.memory_space<vmem>>, vector<4x256xf32>
    tpu.vector_store %arg5[%c4, %c0_25], %50 {strides = array<i32>} : memref<40x512xf32, #tpu.memory_space<vmem>>, vector<4x256xf32>,
    %c0_26 = arith.constant 0 : index
    %c624 = arith.constant 624 : index
    %52 = vector.load %arg4[%c0_26, %c624] : memref<4x1024xf32, #tpu.memory_space<vmem>>, vector<4x256xf32>
    %c4_27 = arith.constant 4 : index
    %c256_28 = arith.constant 256 : index
    %53 = vector.load %arg5[%c4_27, %c256_28] : memref<40x512xf32, #tpu.memory_space<vmem>>, vector<4x256xf32>
    tpu.vector_store %arg5[%c4_27, %c256_28], %52 {strides = array<i32>} : memref<40x512xf32, #tpu.memory_space<vmem>>, vector<4x256xf32>,
    %c0_29 = arith.constant 0 : index
    %c113 = arith.constant 113 : index
    %54 = vector.load %arg4[%c0_29, %c113] : memref<4x1024xf32, #tpu.memory_space<vmem>>, vector<4x256xf32>
    %cst_30 = arith.constant 0.000000e+00 : f32
    %55 = vector.broadcast %cst_30 : f32 to vector<4x256xf32>
    %56 = vector.shape_cast %37 : vector<1x256xi1> to vector<1x256xi1>
    %57 = vector.broadcast %56 : vector<1x256xi1> to vector<4x256xi1>
    %58 = arith.select %57, %54, %55 : vector<4x256xi1>, vector<4x256xf32>
    %c8 = arith.constant 8 : index
    %c0_31 = arith.constant 0 : index
    %59 = vector.load %arg5[%c8, %c0_31] : memref<40x512xf32, #tpu.memory_space<vmem>>, vector<4x256xf32>
    tpu.vector_store %arg5[%c8, %c0_31], %58 {strides = array<i32>} : memref<40x512xf32, #tpu.memory_space<vmem>>, vector<4x256xf32>,
    %c0_32 = arith.constant 0 : index
    %c625 = arith.constant 625 : index
    %60 = vector.load %arg4[%c0_32, %c625] : memref<4x1024xf32, #tpu.memory_space<vmem>>, vector<4x256xf32>
    %cst_33 = arith.constant 0.000000e+00 : f32
    %61 = vector.broadcast %cst_33 : f32 to vector<4x256xf32>
    %62 = vector.shape_cast %37 : vector<1x256xi1> to vector<1x256xi1>
    %63 = vector.broadcast %62 : vector<1x256xi1> to vector<4x256xi1>
    %64 = arith.select %63, %60, %61 : vector<4x256xi1>, vector<4x256xf32>
    %c8_34 = arith.constant 8 : index
    %c256_35 = arith.constant 256 : index
    %65 = vector.load %arg5[%c8_34, %c256_35] : memref<40x512xf32, #tpu.memory_space<vmem>>, vector<4x256xf32>
    tpu.vector_store %arg5[%c8_34, %c256_35], %64 {strides = array<i32>} : memref<40x512xf32, #tpu.memory_space<vmem>>, vector<4x256xf32>,
    %c0_36 = arith.constant 0 : index
    %c127 = arith.constant 127 : index
    %66 = vector.load %arg4[%c0_36, %c127] : memref<4x1024xf32, #tpu.memory_space<vmem>>, vector<4x256xf32>
    %cst_37 = arith.constant 0.000000e+00 : f32
    %67 = vector.broadcast %cst_37 : f32 to vector<4x256xf32>
    %68 = vector.shape_cast %35 : vector<1x256xi1> to vector<1x256xi1>
    %69 = vector.broadcast %68 : vector<1x256xi1> to vector<4x256xi1>
    %70 = arith.select %69, %66, %67 : vector<4x256xi1>, vector<4x256xf32>
    %c12 = arith.constant 12 : index
    %c0_38 = arith.constant 0 : index
    %71 = vector.load %arg5[%c12, %c0_38] : memref<40x512xf32, #tpu.memory_space<vmem>>, vector<4x256xf32>
    tpu.vector_store %arg5[%c12, %c0_38], %70 {strides = array<i32>} : memref<40x512xf32, #tpu.memory_space<vmem>>, vector<4x256xf32>,
    %c0_39 = arith.constant 0 : index
    %c639 = arith.constant 639 : index
    %72 = vector.load %arg4[%c0_39, %c639] : memref<4x1024xf32, #tpu.memory_space<vmem>>, vector<4x256xf32>
    %cst_40 = arith.constant 0.000000e+00 : f32
    %73 = vector.broadcast %cst_40 : f32 to vector<4x256xf32>
    %74 = vector.shape_cast %35 : vector<1x256xi1> to vector<1x256xi1>
    %75 = vector.broadcast %74 : vector<1x256xi1> to vector<4x256xi1>
    %76 = arith.select %75, %72, %73 : vector<4x256xi1>, vector<4x256xf32>
    %c12_41 = arith.constant 12 : index
    %c256_42 = arith.constant 256 : index
    %77 = vector.load %arg5[%c12_41, %c256_42] : memref<40x512xf32, #tpu.memory_space<vmem>>, vector<4x256xf32>
    tpu.vector_store %arg5[%c12_41, %c256_42], %76 {strides = array<i32>} : memref<40x512xf32, #tpu.memory_space<vmem>>, vector<4x256xf32>,
    %c0_43 = arith.constant 0 : index
    %c128_44 = arith.constant 128 : index
    %78 = vector.load %arg4[%c0_43, %c128_44] : memref<4x1024xf32, #tpu.memory_space<vmem>>, vector<4x256xf32>
    %c16 = arith.constant 16 : index
    %c0_45 = arith.constant 0 : index
    %79 = vector.load %arg5[%c16, %c0_45] : memref<40x512xf32, #tpu.memory_space<vmem>>, vector<4x256xf32>
    tpu.vector_store %arg5[%c16, %c0_45], %78 {strides = array<i32>} : memref<40x512xf32, #tpu.memory_space<vmem>>, vector<4x256xf32>,
    %c0_46 = arith.constant 0 : index
    %c640_47 = arith.constant 640 : index
    %80 = vector.load %arg4[%c0_46, %c640_47] : memref<4x1024xf32, #tpu.memory_space<vmem>>, vector<4x256xf32>
    %c16_48 = arith.constant 16 : index
    %c256_49 = arith.constant 256 : index
    %81 = vector.load %arg5[%c16_48, %c256_49] : memref<40x512xf32, #tpu.memory_space<vmem>>, vector<4x256xf32>
    tpu.vector_store %arg5[%c16_48, %c256_49], %80 {strides = array<i32>} : memref<40x512xf32, #tpu.memory_space<vmem>>, vector<4x256xf32>,
    %c0_50 = arith.constant 0 : index
    %c129 = arith.constant 129 : index
    %82 = vector.load %arg4[%c0_50, %c129] : memref<4x1024xf32, #tpu.memory_space<vmem>>, vector<4x256xf32>
    %cst_51 = arith.constant 0.000000e+00 : f32
    %83 = vector.broadcast %cst_51 : f32 to vector<4x256xf32>
    %84 = vector.shape_cast %37 : vector<1x256xi1> to vector<1x256xi1>
    %85 = vector.broadcast %84 : vector<1x256xi1> to vector<4x256xi1>
    %86 = arith.select %85, %82, %83 : vector<4x256xi1>, vector<4x256xf32>
    %c20 = arith.constant 20 : index
    %c0_52 = arith.constant 0 : index
    %87 = vector.load %arg5[%c20, %c0_52] : memref<40x512xf32, #tpu.memory_space<vmem>>, vector<4x256xf32>
    tpu.vector_store %arg5[%c20, %c0_52], %86 {strides = array<i32>} : memref<40x512xf32, #tpu.memory_space<vmem>>, vector<4x256xf32>,
    %c0_53 = arith.constant 0 : index
    %c641 = arith.constant 641 : index
    %88 = vector.load %arg4[%c0_53, %c641] : memref<4x1024xf32, #tpu.memory_space<vmem>>, vector<4x256xf32>
    %cst_54 = arith.constant 0.000000e+00 : f32
    %89 = vector.broadcast %cst_54 : f32 to vector<4x256xf32>
    %90 = vector.shape_cast %37 : vector<1x256xi1> to vector<1x256xi1>
    %91 = vector.broadcast %90 : vector<1x256xi1> to vector<4x256xi1>
    %92 = arith.select %91, %88, %89 : vector<4x256xi1>, vector<4x256xf32>
    %c20_55 = arith.constant 20 : index
    %c256_56 = arith.constant 256 : index
    %93 = vector.load %arg5[%c20_55, %c256_56] : memref<40x512xf32, #tpu.memory_space<vmem>>, vector<4x256xf32>
    tpu.vector_store %arg5[%c20_55, %c256_56], %92 {strides = array<i32>} : memref<40x512xf32, #tpu.memory_space<vmem>>, vector<4x256xf32>,
    %c0_57 = arith.constant 0 : index
    %c143 = arith.constant 143 : index
    %94 = vector.load %arg4[%c0_57, %c143] : memref<4x1024xf32, #tpu.memory_space<vmem>>, vector<4x256xf32>
    %cst_58 = arith.constant 0.000000e+00 : f32
    %95 = vector.broadcast %cst_58 : f32 to vector<4x256xf32>
    %96 = vector.shape_cast %35 : vector<1x256xi1> to vector<1x256xi1>
    %97 = vector.broadcast %96 : vector<1x256xi1> to vector<4x256xi1>
    %98 = arith.select %97, %94, %95 : vector<4x256xi1>, vector<4x256xf32>
    %c24 = arith.constant 24 : index
    %c0_59 = arith.constant 0 : index
    %99 = vector.load %arg5[%c24, %c0_59] : memref<40x512xf32, #tpu.memory_space<vmem>>, vector<4x256xf32>
    tpu.vector_store %arg5[%c24, %c0_59], %98 {strides = array<i32>} : memref<40x512xf32, #tpu.memory_space<vmem>>, vector<4x256xf32>,
    %c0_60 = arith.constant 0 : index
    %c655 = arith.constant 655 : index
    %100 = vector.load %arg4[%c0_60, %c655] : memref<4x1024xf32, #tpu.memory_space<vmem>>, vector<4x256xf32>
    %cst_61 = arith.constant 0.000000e+00 : f32
    %101 = vector.broadcast %cst_61 : f32 to vector<4x256xf32>
    %102 = vector.shape_cast %35 : vector<1x256xi1> to vector<1x256xi1>
    %103 = vector.broadcast %102 : vector<1x256xi1> to vector<4x256xi1>
    %104 = arith.select %103, %100, %101 : vector<4x256xi1>, vector<4x256xf32>
    %c24_62 = arith.constant 24 : index
    %c256_63 = arith.constant 256 : index
    %105 = vector.load %arg5[%c24_62, %c256_63] : memref<40x512xf32, #tpu.memory_space<vmem>>, vector<4x256xf32>
    tpu.vector_store %arg5[%c24_62, %c256_63], %104 {strides = array<i32>} : memref<40x512xf32, #tpu.memory_space<vmem>>, vector<4x256xf32>,
    %c0_64 = arith.constant 0 : index
    %c144 = arith.constant 144 : index
    %106 = vector.load %arg4[%c0_64, %c144] : memref<4x1024xf32, #tpu.memory_space<vmem>>, vector<4x256xf32>
    %c28 = arith.constant 28 : index
    %c0_65 = arith.constant 0 : index
    %107 = vector.load %arg5[%c28, %c0_65] : memref<40x512xf32, #tpu.memory_space<vmem>>, vector<4x256xf32>
    tpu.vector_store %arg5[%c28, %c0_65], %106 {strides = array<i32>} : memref<40x512xf32, #tpu.memory_space<vmem>>, vector<4x256xf32>,
    %c0_66 = arith.constant 0 : index
    %c656 = arith.constant 656 : index
    %108 = vector.load %arg4[%c0_66, %c656] : memref<4x1024xf32, #tpu.memory_space<vmem>>, vector<4x256xf32>
    %c28_67 = arith.constant 28 : index
    %c256_68 = arith.constant 256 : index
    %109 = vector.load %arg5[%c28_67, %c256_68] : memref<40x512xf32, #tpu.memory_space<vmem>>, vector<4x256xf32>
    tpu.vector_store %arg5[%c28_67, %c256_68], %108 {strides = array<i32>} : memref<40x512xf32, #tpu.memory_space<vmem>>, vector<4x256xf32>,
    %c0_69 = arith.constant 0 : index
    %c145 = arith.constant 145 : index
    %110 = vector.load %arg4[%c0_69, %c145] : memref<4x1024xf32, #tpu.memory_space<vmem>>, vector<4x256xf32>
    %cst_70 = arith.constant 0.000000e+00 : f32
    %111 = vector.broadcast %cst_70 : f32 to vector<4x256xf32>
    %112 = vector.shape_cast %37 : vector<1x256xi1> to vector<1x256xi1>
    %113 = vector.broadcast %112 : vector<1x256xi1> to vector<4x256xi1>
    %114 = arith.select %113, %110, %111 : vector<4x256xi1>, vector<4x256xf32>
    %c32 = arith.constant 32 : index
    %c0_71 = arith.constant 0 : index
    %115 = vector.load %arg5[%c32, %c0_71] : memref<40x512xf32, #tpu.memory_space<vmem>>, vector<4x256xf32>
    tpu.vector_store %arg5[%c32, %c0_71], %114 {strides = array<i32>} : memref<40x512xf32, #tpu.memory_space<vmem>>, vector<4x256xf32>,
    %c0_72 = arith.constant 0 : index
    %c657 = arith.constant 657 : index
    %116 = vector.load %arg4[%c0_72, %c657] : memref<4x1024xf32, #tpu.memory_space<vmem>>, vector<4x256xf32>
    %cst_73 = arith.constant 0.000000e+00 : f32
    %117 = vector.broadcast %cst_73 : f32 to vector<4x256xf32>
    %118 = vector.shape_cast %37 : vector<1x256xi1> to vector<1x256xi1>
    %119 = vector.broadcast %118 : vector<1x256xi1> to vector<4x256xi1>
    %120 = arith.select %119, %116, %117 : vector<4x256xi1>, vector<4x256xf32>
    %c32_74 = arith.constant 32 : index
    %c256_75 = arith.constant 256 : index
    %121 = vector.load %arg5[%c32_74, %c256_75] : memref<40x512xf32, #tpu.memory_space<vmem>>, vector<4x256xf32>
    tpu.vector_store %arg5[%c32_74, %c256_75], %120 {strides = array<i32>} : memref<40x512xf32, #tpu.memory_space<vmem>>, vector<4x256xf32>,
    %c0_76 = arith.constant 0 : index
    %c0_77 = arith.constant 0 : index
    %122 = vector.load %arg1[%c0_76, %c0_77] : memref<8x40xf32, #tpu.memory_space<vmem>>, vector<8x40xf32>
    %c0_78 = arith.constant 0 : index
    %c0_79 = arith.constant 0 : index
    %123 = vector.load %arg5[%c0_78, %c0_79] : memref<40x512xf32, #tpu.memory_space<vmem>>, vector<40x512xf32>
    %cst_80 = arith.constant dense<0.000000e+00> : vector<8x512xf32>
    %124 = tpu.matmul %122, %123, %cst_80 {dimension_numbers = #tpu.dot_dimension_numbers<[1], [0], [0], [1], [0, 0, 1, 1], [], []>} : vector<8x40xf32>, vector<40x512xf32>, vector<8x512xf32> -> vector<8x512xf32>
    %cst_81 = arith.constant 2.000000e-01 : f32
    %125 = vector.broadcast %cst_81 : f32 to vector<8x512xf32>
    %126 = arith.mulf %125, %124 : vector<8x512xf32>
    %127 = arith.maximumf %124, %126 : vector<8x512xf32>
    %c511_i32 = arith.constant 511 : i32
    %128 = tpu.dynamic_rotate %127 by %c511_i32 dim 1 : vector<8x512xf32>, i32 -> vector<8x512xf32>
    %129 = arith.maximumf %127, %128 : vector<8x512xf32>
    %c496_i32 = arith.constant 496 : i32
    %130 = tpu.dynamic_rotate %129 by %c496_i32 dim 1 : vector<8x512xf32>, i32 -> vector<8x512xf32>
    %131 = arith.maximumf %129, %130 : vector<8x512xf32>
    %132 = vector.extract_strided_slice %131 {offsets = [0, 0], sizes = [8, 256], strides = [1, 1]} : vector<8x512xf32> to vector<8x256xf32>
    %c0_82 = arith.constant 0 : index
    %c0_83 = arith.constant 0 : index
    %133 = vector.load %arg2[%c0_82, %c0_83] : memref<256x64xf32, #tpu.memory_space<vmem>>, vector<256x64xf32>
    %cst_84 = arith.constant dense<0.000000e+00> : vector<8x64xf32>
    %134 = tpu.matmul %132, %133, %cst_84 {dimension_numbers = #tpu.dot_dimension_numbers<[1], [0], [0], [1], [0, 0, 1, 1], [], []>} : vector<8x256xf32>, vector<256x64xf32>, vector<8x64xf32> -> vector<8x64xf32>
    %135 = vector.extract_strided_slice %131 {offsets = [0, 256], sizes = [8, 256], strides = [1, 1]} : vector<8x512xf32> to vector<8x256xf32>
    %c0_85 = arith.constant 0 : index
    %c0_86 = arith.constant 0 : index
    %136 = vector.load %arg2[%c0_85, %c0_86] : memref<256x64xf32, #tpu.memory_space<vmem>>, vector<256x64xf32>
    %cst_87 = arith.constant dense<0.000000e+00> : vector<8x64xf32>
    %137 = tpu.matmul %135, %136, %cst_87 {dimension_numbers = #tpu.dot_dimension_numbers<[1], [0], [0], [1], [0, 0, 1, 1], [], []>} : vector<8x256xf32>, vector<256x64xf32>, vector<8x64xf32> -> vector<8x64xf32>
    %138 = tpu.concatenate %134, %137 in 1 : vector<8x64xf32>, vector<8x64xf32> -> vector<8x128xf32>
    %c0_88 = arith.constant 0 : index
    %c0_89 = arith.constant 0 : index
    %139 = vector.load %arg3[%c0_88, %c0_89] : memref<8x128xf32, #tpu.memory_space<vmem>>, vector<8x128xf32>
    tpu.vector_store %arg3[%c0_88, %c0_89], %138 {strides = array<i32>} : memref<8x128xf32, #tpu.memory_space<vmem>>, vector<8x128xf32>,
    return
  }
}

</mosaic_0001>

<bundles_post_ra>
// kernel: tpu_custom_call.1
= control target key start
LH: loop header
LB: loop body
LE: loop exit
PB: predicated region body
PF: predicated region fallthrough
CT: control target
= control target key end

     0   :  { %s1182_s0 = inlined_call_operand.vmem [shape: f32[2,4,256], index: 0, kind: input, shape index: {}]   ;;  %s1183_s1 = inlined_call_operand.vmem [shape: f32[8,40], index: 1, kind: input, shape index: {}]   ;;  %s1184_s2 = inlined_call_operand.vmem [shape: f32[256,64], index: 2, kind: input, shape index: {}]   ;;  %s1185_s3 = inlined_call_operand.hbm [shape: f32[8,128], index: 3, kind: output, shape index: {}]  }
   0x1   :  { %v889_v0 = vld [vmem:[%s1182_s0] sm:$0xff]  ;;  %v894_v1 = vld [vmem:[%s1182_s0 + $0x8] sm:$0xff] }
   0x2   :  { %18 = vst [vmem:[#allocation2 + $0x4] sm:$0xff] %v889_v0 }
   0x3   :  { %8 = vsyncpa [#allocation5], 0  ;;  %23 = vst [vmem:[#allocation2 + $0x14] sm:$0xff] %v894_v1  ;;  %v855_v2 = vmov 0.0   ;;  %s856_s0 = smov 17   ;;  %s857_s16 = smov 16   ;;  %v24_v58 = vlaneseq }
   0x4   :  { %15 = vst [vmem:[#allocation2] sm:$0xf] %v855_v2  ;;  %s858_s17 = smov 15   ;;  %s859_s18 = smov 1   ;;  %vm87_vm3 = vcmask 138240   ;;  %vm137_vm4 = vcmask 130048  }
   0x5   :  { %19 = vst [vmem:[#allocation2 + $0x10] sm:$0xf] %v855_v2  ;;  %s860_s19 = smov 127   ;;  %s861_s20 = smov 113   ;;  %v25_v60 = vshrl.u32 %v24_v58, 7  ;;  %vm187_vm5 = vcmask 121856  }
   0x6   :  { %16 = vst [vmem:[#allocation2 + $0xc] sm:$0xf] %v855_v2  ;;  %s862_s21 = smov 112   ;;  %s863_s22 = smov 111   ;;  %vm236_vm8 = vcmask 7168   ;;  %vm315_vm9 = vcmask 1039360  }
   0x7   :  { %20 = vst [vmem:[#allocation2 + $0x1c] sm:$0xf] %v855_v2  ;;  %vm26_vm0 = vcmp.eq.s32.totalorder %v25_v60, 0  ;;  %vm376_vm10 = vcmask 924672   ;;  %vm426_vm11 = vcmask 916480   ;;  %vm472_vm12 = vcmask 908288  }
   0x8   :  { %v788_v62 = vsel %vm26_vm0, 1.0, %v855_v2  ;;  %vm526_vm13 = vcmask 326656   ;;  %s865_s30 = smov [#allocation4]   ;;  %s778_s7 = sshll.u32 %s1185_s3, 4  ;;  %vm768_vm0 = vcmask 523264   ;;  %s779_s7 = int_to_ptr.hbm [resolvable:$true] %s778_s7 }
   0x9   :  { %v68_v3 = vld [vmem:[#allocation2 + $0x8] sm:$0xf]  ;;  %s776_s4 = sshll.u32 %s865_s30, 4  ;;  %s777_s4 = int_to_ptr.vmem [resolvable:$true] %s776_s4 }
   0xa   :  { %77 = vst [vmem:[#allocation1 + $0x10] ss:$2 sm:$0xff] %v68_v3  ;;  %v97_v5 = vld [vmem:[#allocation2 + $0x18] sm:$0xf]  ;;  %v121_v10 = vld [vmem:[#allocation2 + $0x8] sm:$0xf] }
   0xb   :  { %v67_v4 = vld [vmem:[#allocation2] sm:$0xff]  ;;  %v145_v14 = vld [vmem:[#allocation2 + $0x18] sm:$0xf]  ;;  %v168_v18 = vld [vmem:[#allocation2 + $0x8] sm:$0xf]  ;;  %v30_v3 = vrot.slane %v788_v62, 4 }
   0xc   :  { %75 = vst [vmem:[#allocation1] ss:$2 sm:$0xff] %v67_v4  ;;  %v96_v7 = vld [vmem:[#allocation2 + $0x10] sm:$0xff]  ;;  %v197_v22 = vld [vmem:[#allocation2 + $0x18] sm:$0xf] }
   0xd   :  { %v221_v26 = vld [vmem:[#allocation2 + $0x8] sm:$0xf]  ;;  %v252_v30 = vld [vmem:[#allocation2 + $0x18] sm:$0xf]  ;;  %v300_v34 = vld [vmem:[#allocation2 + $0xc] sm:$0xf] }
   0xe   :  { %v331_v38 = vld [vmem:[#allocation2 + $0x1c] sm:$0xf]  ;;  %v361_v42 = vld [vmem:[#allocation2 + $0xc] sm:$0xf]  ;;  %32 = vst [vmem:[#allocation3 + $0x80] sm:$0xf0] %v30_v3 }
   0xf   :  { %v386_v46 = vld [vmem:[#allocation2 + $0x1c] sm:$0xf]  ;;  %v410_v50 = vld [vmem:[#allocation2 + $0xc] sm:$0xf]  ;;  %33 = vst [vmem:[#allocation3 + $0x18] sm:$0xf0] %v30_v3 }
  0x10   :  { %v434_v54 = vld [vmem:[#allocation2 + $0x1c] sm:$0xf]  ;;  %v457_v59 = vld [vmem:[#allocation2 + $0xc] sm:$0xf]  ;;  %34 = vst [vmem:[#allocation3 + $0x30] sm:$0xf0] %v30_v3 }
  0x11   :  { %v902_v6 = vld.sshfl [vmem:[#allocation1 + $0x10] sm:$0xff pattern:$0x75316420]  ;;  %35 = vst [vmem:[#allocation3 + $0x98] sm:$0xf0] %v30_v3 }
  0x12   :  { %102 = vst [vmem:[#allocation1 + $0x10] ss:$2 sm:$0xff] %v97_v5 }
  0x13   :  { %v904_v8 = vld.sshfl [vmem:[#allocation1] sm:$0xff pattern:$0x75316420]  ;;  %v906_v9 = vld.sshfl [vmem:[#allocation1 + $0x8] sm:$0xff pattern:$0x75316420] }
  0x14   :  { %100 = vst [vmem:[#allocation1] ss:$2 sm:$0xff] %v96_v7 }
  0x19   :  { %v105_v11 = vld.sshfl [vmem:[#allocation1 + $0x10] sm:$0xff pattern:$0x75316420] }
  0x1a   :  { %110 = vrot.lane.b32.xlu1 %v105_v11, %s856_s0  ;;  %127 = vst [vmem:[#allocation1 + $0x11] ss:$2 sm:$0xff] %v121_v10  ;;  %v940_v10 = vand.u32 127, %v24_v58 }
  0x1b   :  { %v104_v12 = vld.sshfl [vmem:[#allocation1 + $0x8] sm:$0xff pattern:$0x75316420]  ;;  %v103_v13 = vld.sshfl [vmem:[#allocation1] sm:$0xff pattern:$0x75316420] }
  0x1c   :  { %108 = vrot.lane.b32.xlu0 %v104_v12, %s856_s0  ;;  %125 = vst [vmem:[#allocation1 + $0x1] ss:$2 sm:$0xff] %v67_v4  ;;  %106 = vrot.lane.b32.xlu2 %v103_v13, %s856_s0  ;;  %v38_v12 = vadd.s32 128, %v940_v10  ;;  %vm626_vm14 = vcmp.lt.s32.totalorder %v940_v10, 127  ;;  %vm643_vm15 = vcmp.lt.s32.totalorder %v940_v10, 112 }
  0x21   :  { %v911_v15 = vld.sshfl [vmem:[#allocation1 + $0x10] sm:$0xff pattern:$0x75316420] }
  0x22   :  { %151 = vst [vmem:[#allocation1 + $0x11] ss:$2 sm:$0xff] %v145_v14 }
  0x23   :  { %v913_v16 = vld.sshfl [vmem:[#allocation1] sm:$0xff pattern:$0x75316420]  ;;  %v915_v17 = vld.sshfl [vmem:[#allocation1 + $0x8] sm:$0xff pattern:$0x75316420] }
  0x24   :  { %149 = vst [vmem:[#allocation1 + $0x1] ss:$2 sm:$0xff] %v96_v7 }
  0x29   :  { %v154_v19 = vld.sshfl [vmem:[#allocation1 + $0x10] sm:$0xff pattern:$0x75316420] }
  0x2a   :  { %159 = vrot.lane.b32.xlu1 %v154_v19, %s857_s16  ;;  %177 = vst [vmem:[#allocation1 + $0x10] ss:$2 sm:$0xff] %v168_v18  ;;  %v43_v19 = vand.u32 15, %v940_v10 }
  0x2b   :  { %v153_v20 = vld.sshfl [vmem:[#allocation1 + $0x8] sm:$0xff pattern:$0x75316420]  ;;  %v152_v21 = vld.sshfl [vmem:[#allocation1] sm:$0xff pattern:$0x75316420] }
  0x2c   :  { %157 = vrot.lane.b32.xlu0 %v153_v20, %s857_s16  ;;  %175 = vst [vmem:[#allocation1] ss:$2 sm:$0xff] %v67_v4  ;;  %155 = vrot.lane.b32.xlu2 %v152_v21, %s857_s16  ;;  %v50_v20 = vand.u32 15, %v38_v12  ;;  %vm948_vm1 = vcmp.ge.s32.totalorder %v43_v19, 1  ;;  %vm982_vm7 = vcmp.le.s32.totalorder %v43_v19, 14 }
  0x2e   :  { %vm952_vm2 = vcmp.ge.s32.totalorder %v50_v20, 1  ;;  %vm978_vm6 = vcmp.le.s32.totalorder %v50_v20, 14 }
  0x31   :  { %v180_v23 = vld.sshfl [vmem:[#allocation1 + $0x10] sm:$0xff pattern:$0x75316420] }
  0x32   :  { %202 = vst [vmem:[#allocation1 + $0x10] ss:$2 sm:$0xff] %v197_v22 }
  0x33   :  { %v178_v24 = vld.sshfl [vmem:[#allocation1] sm:$0xff pattern:$0x75316420]  ;;  %v179_v25 = vld.sshfl [vmem:[#allocation1 + $0x8] sm:$0xff pattern:$0x75316420] }
  0x34   :  { %185 = vrot.lane.b32.xlu0 %v180_v23, %s858_s17  ;;  %181 = vrot.lane.b32.xlu1 %v178_v24, %s858_s17  ;;  %200 = vst [vmem:[#allocation1] ss:$2 sm:$0xff] %v96_v7  ;;  %v505_v24 = vld [vmem:[%s1183_s1] sm:$0xff] }
  0x35   :  { %183 = vrot.lane.b32.xlu2 %v179_v25, %s858_s17 }
  0x39   :  { %v205_v27 = vld.sshfl [vmem:[#allocation1 + $0x10] sm:$0xff pattern:$0x75316420] }
  0x3a   :  { %226 = vst [vmem:[#allocation1 + $0x10] ss:$2 sm:$0xff] %v221_v26 }
  0x3b   :  { %v204_v28 = vld.sshfl [vmem:[#allocation1 + $0x8] sm:$0xff pattern:$0x75316420]  ;;  %v203_v29 = vld.sshfl [vmem:[#allocation1] sm:$0xff pattern:$0x75316420] }
  0x3c   :  { %208 = vrot.lane.b32.xlu1 %v204_v28, %s858_s17  ;;  %206 = vrot.lane.b32.xlu0 %v203_v29, %s858_s17  ;;  %224 = vst [vmem:[#allocation1] ss:$2 sm:$0xff] %v67_v4 }
  0x3d   :  { %210 = vrot.lane.b32.xlu2 %v205_v27, %s858_s17 }
  0x41   :  { %v229_v31 = vld.sshfl [vmem:[#allocation1 + $0x10] sm:$0xff pattern:$0x75316420] }
  0x42   :  { %257 = vst [vmem:[#allocation1 + $0x10] ss:$2 sm:$0xff] %v252_v30 }
  0x43   :  { %v227_v32 = vld.sshfl [vmem:[#allocation1] sm:$0xff pattern:$0x75316420]  ;;  %v228_v33 = vld.sshfl [vmem:[#allocation1 + $0x8] sm:$0xff pattern:$0x75316420] }
  0x44   :  { %234 = vrot.lane.b32.xlu0 %v229_v31, %s859_s18  ;;  %230 = vrot.lane.b32.xlu1 %v227_v32, %s859_s18  ;;  %255 = vst [vmem:[#allocation1] ss:$2 sm:$0xff] %v96_v7  ;;  %v482_v7 = vld [vmem:[#allocation2 + $0x1c] sm:$0xf] }
  0x45   :  { %232 = vrot.lane.b32.xlu2 %v228_v33, %s859_s18 }
  0x49   :  { %v260_v35 = vld.sshfl [vmem:[#allocation1 + $0x10] sm:$0xff pattern:$0x75316420] }
  0x4a   :  { %305 = vst [vmem:[#allocation1 + $0x10] ss:$2 sm:$0xff] %v300_v34 }
  0x4b   :  { %v259_v36 = vld.sshfl [vmem:[#allocation1 + $0x8] sm:$0xff pattern:$0x75316420]  ;;  %v258_v37 = vld.sshfl [vmem:[#allocation1] sm:$0xff pattern:$0x75316420] }
  0x4c   :  { %263 = vrot.lane.b32.xlu1 %v259_v36, %s859_s18  ;;  %261 = vrot.lane.b32.xlu0 %v258_v37, %s859_s18  ;;  %283 = vst [vmem:[#allocation1] ss:$2 sm:$0xff] %v889_v0 }
  0x4d   :  { %265 = vrot.lane.b32.xlu2 %v260_v35, %s859_s18 }
  0x51   :  { %v308_v39 = vld.sshfl [vmem:[#allocation1 + $0x10] sm:$0xff pattern:$0x75316420] }
  0x52   :  { %336 = vst [vmem:[#allocation1 + $0x10] ss:$2 sm:$0xff] %v331_v38 }
  0x53   :  { %v284_v40 = vld.sshfl [vmem:[#allocation1] sm:$0xff pattern:$0x75316420]  ;;  %v285_v41 = vld.sshfl [vmem:[#allocation1 + $0x8] sm:$0xff pattern:$0x75316420] }
  0x54   :  { %292 = vst [vmem:[#allocation1] ss:$2 sm:$0xff] %v894_v1  ;;  %313 = vrot.lane.b32.xlu1 %v308_v39, %s860_s19 }
  0x55   :  { %288 = vst [vmem:[#allocation3 + $0x38] sm:$0xf] %v284_v40 }
  0x56   :  { %289 = vst [vmem:[#allocation3 + $0x90] sm:$0xf] %v285_v41 }
  0x59   :  { %v339_v43 = vld.sshfl [vmem:[#allocation1 + $0x10] sm:$0xff pattern:$0x75316420] }
  0x5a   :  { %344 = vrot.lane.b32.xlu2 %v339_v43, %s860_s19  ;;  %366 = vst [vmem:[#allocation1 + $0x10] ss:$2 sm:$0xff] %v361_v42 }
  0x5b   :  { %v293_v44 = vld.sshfl [vmem:[#allocation1] sm:$0xff pattern:$0x75316420]  ;;  %v294_v45 = vld.sshfl [vmem:[#allocation1 + $0x8] sm:$0xff pattern:$0x75316420] }
  0x5c   :  { %297 = vst [vmem:[#allocation3 + $0x78] sm:$0xf] %v293_v44 }
  0x5d   :  { %298 = vst [vmem:[#allocation3 + $0x40] sm:$0xf] %v294_v45 }
  0x5e   :  { %303 = vst [vmem:[#allocation1] ss:$2 sm:$0xff] %v889_v0 }
  0x61   :  { %v369_v47 = vld.sshfl [vmem:[#allocation1 + $0x10] sm:$0xff pattern:$0x75316420] }
  0x62   :  { %374 = vrot.lane.b32.xlu1 %v369_v47, %s861_s20  ;;  %391 = vst [vmem:[#allocation1 + $0x10] ss:$2 sm:$0xff] %v386_v46 }
  0x65   :  { %v307_v48 = vld.sshfl [vmem:[#allocation1 + $0x8] sm:$0xff pattern:$0x75316420]  ;;  %v306_v49 = vld.sshfl [vmem:[#allocation1] sm:$0xff pattern:$0x75316420] }
  0x66   :  { %311 = vrot.lane.b32.xlu0 %v307_v48, %s860_s19  ;;  %309 = vrot.lane.b32.xlu2 %v306_v49, %s860_s19  ;;  %334 = vst [vmem:[#allocation1] ss:$2 sm:$0xff] %v894_v1 }
  0x69   :  { %v394_v51 = vld.sshfl [vmem:[#allocation1 + $0x10] sm:$0xff pattern:$0x75316420] }
  0x6a   :  { %416 = vst [vmem:[#allocation1 + $0x11] ss:$2 sm:$0xff] %v410_v50 }
  0x6d   :  { %v337_v52 = vld.sshfl [vmem:[#allocation1] sm:$0xff pattern:$0x75316420]  ;;  %v338_v53 = vld.sshfl [vmem:[#allocation1 + $0x8] sm:$0xff pattern:$0x75316420] }
  0x6e   :  { %340 = vrot.lane.b32.xlu1 %v337_v52, %s860_s19  ;;  %364 = vst [vmem:[#allocation1] ss:$2 sm:$0xff] %v889_v0  ;;  %342 = vrot.lane.b32.xlu2 %v338_v53, %s860_s19 }
  0x71   :  { %v419_v55 = vld.sshfl [vmem:[#allocation1 + $0x10] sm:$0xff pattern:$0x75316420] }
  0x72   :  { %440 = vst [vmem:[#allocation1 + $0x11] ss:$2 sm:$0xff] %v434_v54 }
  0x75   :  { %v368_v56 = vld.sshfl [vmem:[#allocation1 + $0x8] sm:$0xff pattern:$0x75316420]  ;;  %v367_v57 = vld.sshfl [vmem:[#allocation1] sm:$0xff pattern:$0x75316420] }
  0x76   :  { %372 = vrot.lane.b32.xlu0 %v368_v56, %s861_s20  ;;  %389 = vst [vmem:[#allocation1] ss:$2 sm:$0xff] %v894_v1  ;;  %399 = vrot.lane.b32.xlu2 %v394_v51, %s861_s20  ;;  %v107_v63 = vpop.permute.xlu2 %106 }
  0x79   :  { %v443_v61 = vld.sshfl [vmem:[#allocation1 + $0x10] sm:$0xff pattern:$0x75316420] }
  0x7a   :  { %462 = vst [vmem:[#allocation1 + $0x10] ss:$2 sm:$0xff] %v457_v59  ;;  %v804_v2 = vpack.i.bf16 %v419_v55, %v443_v61 }
  0x7d   :  { %v393_v4 = vld.sshfl [vmem:[#allocation1 + $0x8] sm:$0xff pattern:$0x75316420]  ;;  %v392_v5 = vld.sshfl [vmem:[#allocation1] sm:$0xff pattern:$0x75316420] }
  0x7e   :  { %397 = vrot.lane.b32.xlu1 %v393_v4, %s861_s20  ;;  %395 = vrot.lane.b32.xlu0 %v392_v5, %s861_s20  ;;  %414 = vst [vmem:[#allocation1 + $0x1] ss:$2 sm:$0xff] %v889_v0 }
  0x7f   :  { %370 = vrot.lane.b32.xlu2 %v367_v57, %s861_s20 }
  0x81   :  { %v465_v11 = vld.sshfl [vmem:[#allocation1 + $0x10] sm:$0xff pattern:$0x75316420] }
  0x82   :  { %487 = vst [vmem:[#allocation1 + $0x10] ss:$2 sm:$0xff] %v482_v7 }
  0x85   :  { %v418_v13 = vld.sshfl [vmem:[#allocation1 + $0x8] sm:$0xff pattern:$0x75316420]  ;;  %v417_v14 = vld.sshfl [vmem:[#allocation1] sm:$0xff pattern:$0x75316420] }
  0x86   :  { %422 = vrot.lane.b32.xlu0 %v418_v13, %s862_s21  ;;  %438 = vst [vmem:[#allocation1 + $0x1] ss:$2 sm:$0xff] %v894_v1  ;;  %v156_v18 = vpop.permute.xlu2 %155 }
  0x87   :  { %805 = vrot.lane.b32.xlu2 %v804_v2, %s862_s21 }
  0x89   :  { %v490_v21 = vld.sshfl [vmem:[#allocation1 + $0x10] sm:$0xff pattern:$0x75316420] }
  0x8a   :  { %v809_v22 = vpack.i.bf16 %v465_v11, %v490_v21 }
  0x8c   :  { %810 = vrot.lane.b32.xlu1 %v809_v22, %s863_s22  ;;  %v111_v27 = vpop.permute.xlu1 %110 }
  0x8d   :  { %v441_v25 = vld.sshfl [vmem:[#allocation1] sm:$0xff pattern:$0x75316420]  ;;  %v442_v26 = vld.sshfl [vmem:[#allocation1 + $0x8] sm:$0xff pattern:$0x75316420] }
  0x8e   :  { %444 = vrot.lane.b32.xlu0 %v441_v25, %s862_s21  ;;  %460 = vst [vmem:[#allocation1] ss:$2 sm:$0xff] %v889_v0  ;;  %v109_v28 = vpop.permute.xlu0 %108 }
  0x8f   :  { %v112_v29 = vsel %vm87_vm3, %v107_v63, %v109_v28  ;;  %v113_v30 = vsel %vm87_vm3, %v109_v28, %v111_v27  ;;  %420 = vrot.lane.b32.xlu2 %v417_v14, %s862_s21  ;;  %v184_v31 = vpop.permute.xlu2 %183 }
  0x90   :  { %v116_v32 = vsel %vm948_vm1, %v112_v29, 0.0  ;;  %v117_v33 = vsel %vm952_vm2, %v113_v30, 0.0 }
  0x91   :  { %118 = vst [vmem:[#allocation3 + $0x58] sm:$0xf] %v116_v32 }
  0x92   :  { %119 = vst [vmem:[#allocation3 + $0x60] sm:$0xf] %v117_v33 }
  0x94   :  { %446 = vrot.lane.b32.xlu1 %v442_v26, %s862_s21 }
  0x95   :  { %v463_v0 = vld.sshfl [vmem:[#allocation1] sm:$0xff pattern:$0x75316420]  ;;  %v464_v34 = vld.sshfl [vmem:[#allocation1 + $0x8] sm:$0xff pattern:$0x75316420] }
  0x96   :  { %466 = vrot.lane.b32.xlu0 %v463_v0, %s863_s22  ;;  %485 = vst [vmem:[#allocation1] ss:$2 sm:$0xff] %v894_v1 }
  0x97   :  { %v211_v35 = vpop.permute.xlu2 %210  ;;  %83 = vrot.lane.b32.xlu2 %v906_v9, %s856_s0 }
  0x9c   :  { %468 = vrot.lane.b32.xlu1 %v464_v34, %s863_s22  ;;  %v160_v36 = vpop.permute.xlu1 %159 }
  0x9d   :  { %v488_v37 = vld.sshfl [vmem:[#allocation1] sm:$0xff pattern:$0x75316420]  ;;  %v489_v41 = vld.sshfl [vmem:[#allocation1 + $0x8] sm:$0xff pattern:$0x75316420] }
  0x9e   :  { %491 = vrot.lane.b32.xlu0 %v488_v37, %s863_s22  ;;  %v158_v38 = vpop.permute.xlu0 %157 }
  0x9f   :  { %v161_v39 = vsel %vm137_vm4, %v156_v18, %v158_v38  ;;  %v162_v40 = vsel %vm137_vm4, %v158_v38, %v160_v36  ;;  %133 = vrot.lane.b32.xlu2 %v915_v17, %s857_s16  ;;  %v233_v1 = vpop.permute.xlu2 %232 }
  0xa0   :  { %165 = vst [vmem:[#allocation3 + $0x58] sm:$0xf0] %v161_v39 }
  0xa1   :  { %166 = vst [vmem:[#allocation3 + $0x60] sm:$0xf0] %v162_v40 }
  0xa4   :  { %81 = vrot.lane.b32.xlu1 %v904_v8, %s856_s0 }
  0xa6   :  { %493 = vrot.lane.b32.xlu0 %v489_v41, %s863_s22  ;;  %v186_v43 = vpop.permute.xlu0 %185  ;;  %v182_v17 = vpop.permute.xlu1 %181 }
  0xa7   :  { %v189_v44 = vsel %vm187_vm5, %v184_v31, %v186_v43  ;;  %v188_v45 = vsel %vm187_vm5, %v182_v17, %v184_v31  ;;  %v266_v47 = vpop.permute.xlu2 %265 }
  0xa8   :  { %v193_v8 = vsel %vm978_vm6, %v189_v44, 0.0  ;;  %v192_v46 = vsel %vm982_vm7, %v188_v45, 0.0 }
  0xa9   :  { %195 = vst [vmem:[#allocation3 + $0x68] sm:$0xf] %v193_v8 }
  0xaa   :  { %194 = vst [vmem:[#allocation3 + $0x88] sm:$0xf] %v192_v46 }
  0xac   :  { %131 = vrot.lane.b32.xlu1 %v913_v16, %s857_s16 }
  0xae   :  { %85 = vrot.lane.b32.xlu0 %v902_v6, %s856_s0  ;;  %v209_v48 = vpop.permute.xlu1 %208  ;;  %v207_v49 = vpop.permute.xlu0 %206 }
  0xaf   :  { %v213_v50 = vsel %vm187_vm5, %v209_v48, %v211_v35  ;;  %v212_v51 = vsel %vm187_vm5, %v207_v49, %v209_v48 }
  0xb0   :  { %v217_v52 = vsel %vm978_vm6, %v213_v50, 0.0  ;;  %v216_v53 = vsel %vm982_vm7, %v212_v51, 0.0 }
  0xb1   :  { %219 = vst [vmem:[#allocation3 + $0x20] sm:$0xf] %v217_v52 }
  0xb2   :  { %218 = vst [vmem:[#allocation3 + $0x8] sm:$0xf] %v216_v53 }
  0xb4   :  { %v345_v54 = vpop.permute.xlu2 %344 }
  0xb6   :  { %135 = vrot.lane.b32.xlu0 %v911_v15, %s857_s16  ;;  %v235_v6 = vpop.permute.xlu0 %234  ;;  %v231_v16 = vpop.permute.xlu1 %230 }
  0xb7   :  { %v238_v55 = vsel %vm236_vm8, %v233_v1, %v235_v6  ;;  %v237_v56 = vsel %vm236_vm8, %v231_v16, %v233_v1 }
  0xb8   :  { %v242_v57 = vsel %vm952_vm2, %v238_v55, 0.0  ;;  %v241_v58 = vsel %vm948_vm1, %v237_v56, 0.0 }
  0xb9   :  { %v246_v59 = vrot.slane %v242_v57, 4  ;;  %v245_v60 = vrot.slane %v241_v58, 4 }
  0xbb   :  { %250 = vst [vmem:[#allocation3 + $0x68] sm:$0xf0] %v246_v59 }
  0xbc   :  { %249 = vst [vmem:[#allocation3 + $0x88] sm:$0xf0] %v245_v60 }
  0xbe   :  { %v264_v61 = vpop.permute.xlu1 %263  ;;  %v262_v62 = vpop.permute.xlu0 %261 }
  0xbf   :  { %v268_v15 = vsel %vm236_vm8, %v264_v61, %v266_v47  ;;  %v267_v63 = vsel %vm236_vm8, %v262_v62, %v264_v61 }
  0xc0   :  { %v272_v3 = vsel %vm952_vm2, %v268_v15, 0.0  ;;  %v271_v4 = vsel %vm948_vm1, %v267_v63, 0.0  ;;  %v310_v5 = vpop.permute.xlu2 %309 }
  0xc1   :  { %v276_v7 = vrot.slane %v272_v3, 4  ;;  %v275_v11 = vrot.slane %v271_v4, 4 }
  0xc3   :  { %280 = vst [vmem:[#allocation3 + $0x20] sm:$0xf0] %v276_v7 }
  0xc4   :  { %279 = vst [vmem:[#allocation3 + $0x8] sm:$0xf0] %v275_v11 }
  0xc6   :  { %v314_v18 = vpop.permute.xlu1 %313 }
  0xc8   :  { %v343_v2 = vpop.permute.xlu2 %342 }
  0xc9   :  { %v347_v12 = vsel %vm315_vm9, %v343_v2, %v345_v54 }
  0xca   :  { %v351_v13 = vsel %vm978_vm6, %v347_v12, 0.0 }
  0xcb   :  { %v355_v14 = vrot.slane %v351_v13, 4 }
  0xcd   :  { %359 = vst [vmem:[#allocation3 + $0x40] sm:$0xf0] %v355_v14 }
  0xd0   :  { %v400_v21 = vpop.permute.xlu2 %399 }
  0xd4   :  { %v375_v19 = vpop.permute.xlu1 %374 }
  0xd8   :  { %v312_v20 = vpop.permute.xlu0 %311 }
  0xd9   :  { %v316_v22 = vsel %vm315_vm9, %v310_v5, %v312_v20  ;;  %v317_v25 = vsel %vm315_vm9, %v312_v20, %v314_v18  ;;  %v371_v33 = vpop.permute.xlu2 %370 }
  0xda   :  { %v320_v26 = vsel %vm982_vm7, %v316_v22, 0.0  ;;  %v321_v27 = vsel %vm978_vm6, %v317_v25, 0.0  ;;  %v510_v22 = vld [vmem:[#allocation3 + $0x88] sm:$0xff] }
  0xdb   :  { %v324_v28 = vrot.slane %v320_v26, 4  ;;  %v325_v29 = vrot.slane %v321_v27, 4  ;;  %v511_v25 = vld [vmem:[#allocation3 + $0x68] sm:$0xff] }
  0xdd   :  { %328 = vst [vmem:[#allocation3 + $0x38] sm:$0xf0] %v324_v28 }
  0xde   :  { %329 = vst [vmem:[#allocation3 + $0x90] sm:$0xf0] %v325_v29 }
  0xe0   :  { %v341_v30 = vpop.permute.xlu1 %340 }
  0xe1   :  { %v346_v31 = vsel %vm315_vm9, %v341_v30, %v343_v2  ;;  %v806_v39 = vpop.permute.xlu2 %805 }
  0xe2   :  { %v350_v32 = vsel %vm982_vm7, %v346_v31, 0.0  ;;  %v808_v45 = vunpack.i.h.bf16 %v806_v39  ;;  %v807_v51 = vunpack.i.l.bf16 %v806_v39  ;;  %v509_v39 = vld [vmem:[#allocation3 + $0x60] sm:$0xff] }
  0xe3   :  { %v354_v0 = vrot.slane %v350_v32, 4 }
  0xe4   :  { %v514_v18 = vld [vmem:[#allocation3 + $0x38] sm:$0xff] }
  0xe5   :  { %358 = vst [vmem:[#allocation3 + $0x78] sm:$0xf0] %v354_v0  ;;  %v515_v20 = vld [vmem:[#allocation3 + $0x90] sm:$0xff] }
  0xe8   :  { %v373_v34 = vpop.permute.xlu0 %372 }
  0xe9   :  { %v378_v35 = vsel %vm376_vm10, %v373_v34, %v375_v19  ;;  %v377_v36 = vsel %vm376_vm10, %v371_v33, %v373_v34  ;;  %v421_v8 = vpop.permute.xlu2 %420  ;;  %v517_v33 = vld [vmem:[#allocation3 + $0x40] sm:$0xff] }
  0xea   :  { %v382_v37 = vsel %vm952_vm2, %v378_v35, 0.0  ;;  %v381_v38 = vsel %vm948_vm1, %v377_v36, 0.0  ;;  %v512_v35 = vld [vmem:[#allocation3 + $0x8] sm:$0xff] }
  0xeb   :  { %384 = vst [vmem:[#allocation3 + $0x28] sm:$0xf] %v382_v37  ;;  %v513_v37 = vld [vmem:[#allocation3 + $0x20] sm:$0xff] }
  0xec   :  { %383 = vst [vmem:[#allocation3] sm:$0xf] %v381_v38  ;;  %v516_v32 = vld [vmem:[#allocation3 + $0x78] sm:$0xff] }
  0xed   :  { %v508_v38 = vld [vmem:[#allocation3 + $0x58] sm:$0xff] }
  0xf0   :  { %v398_v40 = vpop.permute.xlu1 %397  ;;  %v396_v1 = vpop.permute.xlu0 %395 }
  0xf1   :  { %v402_v41 = vsel %vm376_vm10, %v398_v40, %v400_v21  ;;  %v401_v43 = vsel %vm376_vm10, %v396_v1, %v398_v40  ;;  %v84_v61 = vpop.permute.xlu2 %83 }
  0xf2   :  { %v406_v17 = vsel %vm952_vm2, %v402_v41, 0.0  ;;  %v405_v44 = vsel %vm948_vm1, %v401_v43, 0.0 }
  0xf3   :  { %408 = vst [vmem:[#allocation3 + $0x70] sm:$0xf] %v406_v17 }
  0xf4   :  { %407 = vst [vmem:[#allocation3 + $0x50] sm:$0xf] %v405_v44 }
  0xf8   :  { %v423_v46 = vpop.permute.xlu0 %422 }
  0xf9   :  { %v428_v47 = vsel %vm426_vm11, %v423_v46, %v808_v45  ;;  %v427_v48 = vsel %vm426_vm11, %v421_v8, %v423_v46  ;;  %v134_v19 = vpop.permute.xlu2 %133 }
  0xfa   :  { %432 = vst [vmem:[#allocation3 + $0x28] sm:$0xf0] %v428_v47 }
  0xfb   :  { %431 = vst [vmem:[#allocation3] sm:$0xf0] %v427_v48 }
  0xfe   :  { %v811_v49 = vpop.permute.xlu1 %810 }
  0xff   :  { %v813_v16 = vunpack.i.h.bf16 %v811_v49  ;;  %v812_v15 = vunpack.i.l.bf16 %v811_v49 }
 0x100   :  { %v445_v50 = vpop.permute.xlu0 %444 }
 0x101   :  { %v519_v23 = vld [vmem:[#allocation3 + $0x28] sm:$0xff] }
 0x102   :  { %v518_v14 = vld [vmem:[#allocation3] sm:$0xff] }
 0x106   :  { %v447_v52 = vpop.permute.xlu1 %446 }
 0x107   :  { %v450_v53 = vsel %vm426_vm11, %v445_v50, %v447_v52  ;;  %v451_v54 = vsel %vm426_vm11, %v447_v52, %v807_v51 }
 0x108   :  { %v467_v6 = vpop.permute.xlu0 %466  ;;  %454 = vst [vmem:[#allocation3 + $0x50] sm:$0xf0] %v450_v53 }
 0x109   :  { %455 = vst [vmem:[#allocation3 + $0x70] sm:$0xf0] %v451_v54 }
 0x10e   :  { %v469_v55 = vpop.permute.xlu1 %468 }
 0x10f   :  { %v473_v56 = vsel %vm472_vm12, %v467_v6, %v469_v55  ;;  %v474_v57 = vsel %vm472_vm12, %v469_v55, %v813_v16  ;;  %v520_v30 = vld [vmem:[#allocation3 + $0x50] sm:$0xff] }
 0x110   :  { %v492_v58 = vpop.permute.xlu0 %491  ;;  %v477_v59 = vsel %vm982_vm7, %v473_v56, 0.0  ;;  %v478_v60 = vsel %vm978_vm6, %v474_v57, 0.0  ;;  %v521_v31 = vld [vmem:[#allocation3 + $0x70] sm:$0xff] }
 0x111   :  { %479 = vst [vmem:[#allocation3 + $0x80] sm:$0xf] %v477_v59 }
 0x112   :  { %480 = vst [vmem:[#allocation3 + $0x18] sm:$0xf] %v478_v60 }
 0x116   :  { %v82_v62 = vpop.permute.xlu1 %81 }
 0x117   :  { %v88_v63 = vsel %vm87_vm3, %v82_v62, %v84_v61 }
 0x118   :  { %v494_v3 = vpop.permute.xlu0 %493  ;;  %v92_v4 = vsel %vm948_vm1, %v88_v63, 0.0  ;;  %v522_v5 = vld [vmem:[#allocation3 + $0x80] sm:$0xff] }
 0x119   :  { %v497_v7 = vsel %vm472_vm12, %v492_v58, %v494_v3  ;;  %v498_v11 = vsel %vm472_vm12, %v494_v3, %v812_v15  ;;  %94 = vst [vmem:[#allocation3 + $0x10] sm:$0xf] %v92_v4  ;;  %541 = vmatpush.msra.mxu0 %v522_v5  ;;  %v523_v2 = vld [vmem:[#allocation3 + $0x18] sm:$0xff]  ;;  %v667_v4 = vld [vmem:[%s1184_s2 + $0x78] sm:$0xff] }
 0x11a   :  { %v501_v12 = vsel %vm982_vm7, %v497_v7, 0.0  ;;  %v502_v13 = vsel %vm978_vm6, %v498_v11, 0.0  ;;  %561 = vmatpush.msra.mxu1 %v523_v2  ;;  %v683_v5 = vld [vmem:[%s1184_s2 + $0xf8] sm:$0xff]  ;;  %v666_v7 = vld [vmem:[%s1184_s2 + $0x70] sm:$0xff]  ;;  %v665_v2 = vld [vmem:[%s1184_s2 + $0x68] sm:$0xff] }
 0x11b   :  { %503 = vst [vmem:[#allocation3 + $0x30] sm:$0xf] %v501_v12  ;;  %542 = vmatpush.msra.mxu0 %v518_v14  ;;  %v682_v11 = vld [vmem:[%s1184_s2 + $0xf0] sm:$0xff]  ;;  %v681_v12 = vld [vmem:[%s1184_s2 + $0xe8] sm:$0xff]  ;;  %v680_v14 = vld [vmem:[%s1184_s2 + $0xe0] sm:$0xff] }
 0x11c   :  { %504 = vst [vmem:[#allocation3 + $0x98] sm:$0xf] %v502_v13  ;;  %562 = vmatpush.msra.mxu1 %v519_v23  ;;  %v664_v13 = vld [vmem:[%s1184_s2 + $0x60] sm:$0xff]  ;;  %v663_v23 = vld [vmem:[%s1184_s2 + $0x58] sm:$0xff] }
 0x11d   :  { %543 = vmatpush.msra.mxu0 %v514_v18  ;;  %v679_v18 = vld [vmem:[%s1184_s2 + $0xd8] sm:$0xff] }
 0x11e   :  { %563 = vmatpush.msra.mxu1 %v515_v20  ;;  %v132_v21 = vpop.permute.xlu1 %131  ;;  %v678_v20 = vld [vmem:[%s1184_s2 + $0xd0] sm:$0xff] }
 0x11f   :  { %v138_v42 = vsel %vm137_vm4, %v132_v21, %v134_v19  ;;  %544 = vmatpush.msra.mxu0 %v510_v22  ;;  %v661_v21 = vld [vmem:[%s1184_s2 + $0x48] sm:$0xff] }
 0x120   :  { %v86_v9 = vpop.permute.xlu0 %85  ;;  %142 = vst [vmem:[#allocation3 + $0x10] sm:$0xf0] %v138_v42  ;;  %564 = vmatpush.msra.mxu1 %v511_v25  ;;  %v677_v22 = vld [vmem:[%s1184_s2 + $0xc8] sm:$0xff]  ;;  %v660_v42 = vld [vmem:[%s1184_s2 + $0x40] sm:$0xff] }
 0x121   :  { %v89_v26 = vsel %vm87_vm3, %v84_v61, %v86_v9  ;;  %v676_v25 = vld [vmem:[%s1184_s2 + $0xc0] sm:$0xff]  ;;  %v659_v9 = vld [vmem:[%s1184_s2 + $0x38] sm:$0xff] }
 0x122   :  { %v93_v27 = vsel %vm952_vm2, %v89_v26, 0.0  ;;  %v524_v28 = vld [vmem:[#allocation3 + $0x30] sm:$0xff] }
 0x123   :  { %95 = vst [vmem:[#allocation3 + $0x48] sm:$0xf] %v93_v27  ;;  %581 = vmatpush.msra.mxu2 %v524_v28  ;;  %v525_v29 = vld [vmem:[#allocation3 + $0x98] sm:$0xff]  ;;  %v675_v26 = vld [vmem:[%s1184_s2 + $0xb8] sm:$0xff]  ;;  %v658_v27 = vld [vmem:[%s1184_s2 + $0x30] sm:$0xff] }
 0x124   :  { %601 = vmatpush.msra.mxu3 %v525_v29  ;;  %v674_v28 = vld [vmem:[%s1184_s2 + $0xb0] sm:$0xff]  ;;  %v657_v29 = vld [vmem:[%s1184_s2 + $0x28] sm:$0xff] }
 0x125   :  { %582 = vmatpush.msra.mxu2 %v520_v30  ;;  %v673_v30 = vld [vmem:[%s1184_s2 + $0xa8] sm:$0xff] }
 0x126   :  { %602 = vmatpush.msra.mxu3 %v521_v31  ;;  %v656_v31 = vld [vmem:[%s1184_s2 + $0x20] sm:$0xff] }
 0x127   :  { %583 = vmatpush.msra.mxu2 %v516_v32  ;;  %v506_v0 = vld [vmem:[#allocation3 + $0x10] sm:$0xff]  ;;  %v672_v32 = vld [vmem:[%s1184_s2 + $0xa0] sm:$0xff] }
 0x128   :  { %603 = vmatpush.msra.mxu3 %v517_v33  ;;  %v136_v34 = vpop.permute.xlu0 %135  ;;  %545 = vmatpush.msra.mxu0 %v506_v0  ;;  %v655_v33 = vld [vmem:[%s1184_s2 + $0x18] sm:$0xff] }
 0x129   :  { %v139_v36 = vsel %vm137_vm4, %v134_v19, %v136_v34  ;;  %584 = vmatpush.msra.mxu2 %v512_v35  ;;  %789 = vmatmul.msk.f32.vlgmr.msra.gmra.mxu0 %vm526_vm13, %v505_v24  ;;  %v662_v19 = vld [vmem:[%s1184_s2 + $0x50] sm:$0xff]  ;;  %v671_v0 = vld [vmem:[%s1184_s2 + $0x98] sm:$0xff] }
 0x12a   :  { %143 = vst [vmem:[#allocation3 + $0x48] sm:$0xf0] %v139_v36  ;;  %604 = vmatpush.msra.mxu3 %v513_v37  ;;  %684 = vmatpush.msrb.mxu0 %v667_v4  ;;  %v654_v34 = vld [vmem:[%s1184_s2 + $0x10] sm:$0xff]  ;;  %v669_v36 = vld [vmem:[%s1184_s2 + $0x88] sm:$0xff]  ;;  %v652_v37 = vld [vmem:[%s1184_s2] sm:$0xff] }
 0x12b   :  { %585 = vmatpush.msra.mxu2 %v508_v38  ;;  %v670_v35 = vld [vmem:[%s1184_s2 + $0x90] sm:$0xff]  ;;  %v668_v38 = vld [vmem:[%s1184_s2 + $0x80] sm:$0xff] }
 0x12c   :  { %605 = vmatpush.msra.mxu3 %v509_v39  ;;  %791 = vmatmul.msk.f32.vlgmr.msra.gmra.mxu2 %vm526_vm13, %v505_v24 }
 0x12d   :  { %792 = vmatmul.msk.f32.vlgmr.msra.gmra.mxu3 %vm526_vm13, %v505_v24  ;;  %724 = vmatpush.msrb.mxu2 %v667_v4 }
 0x12e   :  { %744 = vmatpush.msrb.mxu3 %v683_v5  ;;  %685 = vmatpush.msrb.mxu0 %v666_v7 }
 0x12f   :  { %725 = vmatpush.msrb.mxu2 %v666_v7 }
 0x130   :  { %745 = vmatpush.msrb.mxu3 %v682_v11  ;;  %686 = vmatpush.msrb.mxu0 %v665_v2 }
 0x131   :  { %v507_v40 = vld [vmem:[#allocation3 + $0x48] sm:$0xff]  ;;  %726 = vmatpush.msrb.mxu2 %v665_v2 }
 0x132   :  { %565 = vmatpush.msra.mxu1 %v507_v40  ;;  %746 = vmatpush.msrb.mxu3 %v681_v12 }
 0x133   :  { %790 = vmatmul.msk.f32.vlgmr.msra.gmra.mxu1 %vm526_vm13, %v505_v24  ;;  %687 = vmatpush.msrb.mxu0 %v664_v13  ;;  %v653_v24 = vld [vmem:[%s1184_s2 + $0x8] sm:$0xff]  ;;  %s864_s2 = smov 64  }
 0x134   :  { %704 = vmatpush.msrb.mxu1 %v683_v5  ;;  %727 = vmatpush.msrb.mxu2 %v664_v13 }
 0x135   :  { %747 = vmatpush.msrb.mxu3 %v680_v14  ;;  %688 = vmatpush.msrb.mxu0 %v663_v23 }
 0x136   :  { %705 = vmatpush.msrb.mxu1 %v682_v11  ;;  %728 = vmatpush.msrb.mxu2 %v663_v23 }
 0x137   :  { %748 = vmatpush.msrb.mxu3 %v679_v18  ;;  %689 = vmatpush.msrb.mxu0 %v662_v19 }
 0x138   :  { %706 = vmatpush.msrb.mxu1 %v681_v12  ;;  %729 = vmatpush.msrb.mxu2 %v662_v19 }
 0x139   :  { %749 = vmatpush.msrb.mxu3 %v678_v20  ;;  %690 = vmatpush.msrb.mxu0 %v661_v21 }
 0x13a   :  { %707 = vmatpush.msrb.mxu1 %v680_v14  ;;  %730 = vmatpush.msrb.mxu2 %v661_v21 }
 0x13b   :  { %750 = vmatpush.msrb.mxu3 %v677_v22  ;;  %691 = vmatpush.msrb.mxu0 %v660_v42 }
 0x13c   :  { %708 = vmatpush.msrb.mxu1 %v679_v18  ;;  %731 = vmatpush.msrb.mxu2 %v660_v42 }
 0x13d   :  { %751 = vmatpush.msrb.mxu3 %v676_v25  ;;  %692 = vmatpush.msrb.mxu0 %v659_v9 }
 0x13e   :  { %709 = vmatpush.msrb.mxu1 %v678_v20  ;;  %732 = vmatpush.msrb.mxu2 %v659_v9 }
 0x13f   :  { %752 = vmatpush.msrb.mxu3 %v675_v26  ;;  %693 = vmatpush.msrb.mxu0 %v658_v27 }
 0x140   :  { %710 = vmatpush.msrb.mxu1 %v677_v22  ;;  %733 = vmatpush.msrb.mxu2 %v658_v27 }
 0x141   :  { %753 = vmatpush.msrb.mxu3 %v674_v28  ;;  %694 = vmatpush.msrb.mxu0 %v657_v29 }
 0x142   :  { %711 = vmatpush.msrb.mxu1 %v676_v25  ;;  %734 = vmatpush.msrb.mxu2 %v657_v29 }
 0x143   :  { %754 = vmatpush.msrb.mxu3 %v673_v30  ;;  %695 = vmatpush.msrb.mxu0 %v656_v31 }
 0x144   :  { %712 = vmatpush.msrb.mxu1 %v675_v26  ;;  %735 = vmatpush.msrb.mxu2 %v656_v31 }
 0x145   :  { %755 = vmatpush.msrb.mxu3 %v672_v32  ;;  %696 = vmatpush.msrb.mxu0 %v655_v33 }
 0x146   :  { %713 = vmatpush.msrb.mxu1 %v674_v28  ;;  %736 = vmatpush.msrb.mxu2 %v655_v33 }
 0x147   :  { %756 = vmatpush.msrb.mxu3 %v671_v0  ;;  %697 = vmatpush.msrb.mxu0 %v654_v34 }
 0x148   :  { %714 = vmatpush.msrb.mxu1 %v673_v30  ;;  %737 = vmatpush.msrb.mxu2 %v654_v34 }
 0x149   :  { %757 = vmatpush.msrb.mxu3 %v670_v35  ;;  %698 = vmatpush.msrb.mxu0 %v653_v24 }
 0x14a   :  { %715 = vmatpush.msrb.mxu1 %v672_v32  ;;  %738 = vmatpush.msrb.mxu2 %v653_v24 }
 0x14b   :  { %758 = vmatpush.msrb.mxu3 %v669_v36  ;;  %699 = vmatpush.msrb.mxu0 %v652_v37 }
 0x14c   :  { %716 = vmatpush.msrb.mxu1 %v671_v0  ;;  %739 = vmatpush.msrb.mxu2 %v652_v37 }
 0x14d   :  { %759 = vmatpush.msrb.mxu3 %v668_v38 }
 0x14e   :  { %717 = vmatpush.msrb.mxu1 %v670_v35 }
 0x150   :  { %718 = vmatpush.msrb.mxu1 %v669_v36 }
 0x152   :  { %719 = vmatpush.msrb.mxu1 %v668_v38 }
 0x1a6   :  { %v547_v1 = vpop.f32.mrf.mxu0 }
 0x1a7   :  { %v610_v41 = vmul.f32 0.2, %v547_v1 }
 0x1a9   :  { %v614_v48 = vmax.f32 %v547_v1, %v610_v41 }
 0x1af   :  { %v587_v43 = vpop.f32.mrf.mxu2 }
 0x1b0   :  { %v612_v17 = vmul.f32 0.2, %v587_v43  ;;  %v607_v44 = vpop.f32.mrf.mxu3  ;;  %v567_v45 = vpop.f32.mrf.mxu1 }
 0x1b1   :  { %v613_v8 = vmul.f32 0.2, %v607_v44  ;;  %v611_v46 = vmul.f32 0.2, %v567_v45 }
 0x1b2   :  { %v616_v47 = vmax.f32 %v587_v43, %v612_v17 }
 0x1b3   :  { %v617_v49 = vmax.f32 %v607_v44, %v613_v8  ;;  %v615_v50 = vmax.f32 %v567_v45, %v611_v46 }
 0x1b5   :  { %v819_v51 = vpack.i.bf16 %v617_v49, %v616_v47  ;;  %v814_v52 = vpack.i.bf16 %v615_v50, %v614_v48 }
 0x1b7   :  { %820 = vrot.lane.b32.xlu2 %v819_v51, %s860_s19  ;;  %815 = vrot.lane.b32.xlu1 %v814_v52, %s860_s19 }
 0x211   :  { %v821_v53 = vpop.permute.xlu2 %820 }
 0x212   :  { %v823_v54 = vunpack.i.h.bf16 %v821_v53  ;;  %v822_v6 = vunpack.i.l.bf16 %v821_v53 }
 0x214   :  { %v627_v55 = vsel %vm626_vm14, %v822_v6, %v823_v54 }
 0x215   :  { %v1069_v63 = vmax.f32 %v616_v47, %v627_v55 }
 0x229   :  { %v816_v16 = vpop.permute.xlu1 %815 }
 0x22a   :  { %v818_v56 = vunpack.i.h.bf16 %v816_v16  ;;  %v817_v57 = vunpack.i.l.bf16 %v816_v16 }
 0x22c   :  { %v629_v58 = vsel %vm626_vm14, %v817_v57, %v818_v56  ;;  %v628_v59 = vsel %vm626_vm14, %v818_v56, %v822_v6  ;;  %v630_v60 = vsel %vm626_vm14, %v823_v54, %v817_v57 }
 0x22d   :  { %v1063_v61 = vmax.f32 %v615_v50, %v628_v59  ;;  %v1065_v62 = vmax.f32 %v617_v49, %v630_v60  ;;  %v1067_v15 = vmax.f32 %v614_v48, %v629_v58 }
 0x22f   :  { %637 = vrot.lane.b32.xlu2 %v1063_v61, %s862_s21  ;;  %641 = vrot.lane.b32.xlu1 %v1065_v62, %s862_s21  ;;  %v824_v3 = vpack.i.bf16 %v1069_v63, %v1067_v15 }
 0x231   :  { %825 = vrot.lane.b32.xlu0 %v824_v3, %s862_s21 }
 0x289   :  { %v638_v41 = vpop.permute.xlu2 %637 }
 0x2a1   :  { %v642_v43 = vpop.permute.xlu1 %641 }
 0x2a3   :  { %v826_v39 = vpop.permute.xlu0 %825 }
 0x2a4   :  { %v828_v40 = vunpack.i.h.bf16 %v826_v39  ;;  %v827_v1 = vunpack.i.l.bf16 %v826_v39 }
 0x2a6   :  { %v646_v17 = vsel %vm643_vm15, %v827_v1, %v638_v41  ;;  %v645_v44 = vsel %vm643_vm15, %v638_v41, %v828_v40  ;;  %v644_v45 = vsel %vm643_vm15, %v828_v40, %v642_v43  ;;  %v647_v8 = vsel %vm643_vm15, %v642_v43, %v827_v1 }
 0x2a7   :  { %v648_v46 = vmax.f32 %v1067_v15, %v646_v17  ;;  %v649_v47 = vmax.f32 %v1063_v61, %v645_v44  ;;  %v650_v48 = vmax.f32 %v1069_v63, %v644_v45  ;;  %v651_v49 = vmax.f32 %v1065_v62, %v647_v8 }
 0x2a9   :  { %700 = vmatmul.f32.vlgmr.msrb.gmra.mxu0 %v648_v46  ;;  %720 = vmatmul.f32.vlgmr.msrb.gmra.mxu1 %v649_v47 }
 0x2aa   :  { %740 = vmatmul.f32.vlgmr.msrb.gmra.mxu2 %v650_v48  ;;  %760 = vmatmul.f32.vlgmr.msrb.gmra.mxu3 %v651_v49 }
 0x326   :  { %v701_v52 = vpop.f32.mrf.mxu0  ;;  %v721_v53 = vpop.f32.mrf.mxu1 }
 0x327   :  { %v722_v54 = vadd.f32 %v721_v53, %v701_v52 }
 0x32d   :  { %v741_v10 = vpop.f32.mrf.mxu2  ;;  %v761_v50 = vpop.f32.mrf.mxu3 }
 0x32e   :  { %v762_v51 = vadd.f32 %v761_v50, %v741_v10 }
 0x330   :  { %765 = vrot.lane.b32.xlu0 %v762_v51, %s864_s2 }
 0x3a2   :  { %v766_v6 = vpop.permute.xlu0 %765 }
 0x3a3   :  { %v769_v16 = vsel %vm768_vm0, %v722_v54, %v766_v6 }
 0x3a4   :  { %770 = vst [vmem:[#allocation4] sm:$0xff] %v769_v16 }
 0x3a5   :  { %781 = dma.vmem_to_hbm [thread:$0]  %s777_s4, 128, %s779_s7, [#allocation5]  }
 0x3a6   :  { %853 = dma.done.wait [#allocation5], 128  }
 0x3a7   :  { %854 = vsyncadd [#allocation5], 4294967168 }
 0x3a8   :  { %786 = vsyncpa [#allocation5], 1 }

</bundles_post_ra>
